<compile_context>
chip_gen: v7x
topology: tpu7x:2x2x1
jax: 0.10.0
libtpu: 0.0.40
codegen_flags: <defaults>
</compile_context>

<pallas_src>
import math

import jax
import jax.numpy as jnp
from jax.experimental import pallas as pl
from jax.experimental.pallas import tpu as pltpu


def _pick_row_tile(ho, wo, batch, *, target_lanes=8192, min_grid=4):
    """Pick rows-per-tile R such that
       - R*wo (the output tile's lane count) is a multiple of 128 whenever the
         tile is not the whole image (unmasked lane-dense stores),
       - the per-step working set stays modest (~target_lanes output lanes),
       - batch * num_tiles >= min_grid when cheaply possible (v7x megacore)."""
    r_unit = 128 // math.gcd(128, wo)            # smallest R with R*wo % 128 == 0
    if ho * wo <= target_lanes:
        r = ho                                   # whole image per step (full dims)
    else:
        r = max(r_unit, (target_lanes // (r_unit * wo)) * r_unit)
    cdiv = lambda a, b: -(-a // b)
    while batch * cdiv(ho, r) < min_grid and r > r_unit:
        r = max(r_unit, ((r // 2) // r_unit) * r_unit)
    nrt = cdiv(ho, r)
    return r, nrt, nrt * r


def conv_block_forward(x_nchw, weight, bias, alpha, *, kernel_size=9, padding=4,
                       stride=1, out_dtype=None, target_lanes=8192):
    """Forward pass of convelutional_block. x_nchw: (N, Cin, H, W)."""
    assert stride == 1, "module is instantiated with stride=1"
    N, Cin, H, W = x_nchw.shape
    Cout = weight.shape[0]
    K = kernel_size

    Ho = (H + 2 * padding - K) // stride + 1
    Wo = (W + 2 * padding - K) // stride + 1
    KC = K * Cin                                  # per-kh contraction (27)
    KC_pad = -(-KC // 16) * 16                    # 27 -> 32 (bf16 sublane pack)

    out_dtype = x_nchw.dtype if out_dtype is None else out_dtype

    R, nrt, Ho_pad = _pick_row_tile(Ho, Wo, N, target_lanes=target_lanes)
    halo = R + K - 1                              # input rows per output row tile
    T = R * Wo                                    # output lanes per tile
    Hp = Ho_pad + K - 1                           # padded input rows needed
    # (padded width = Wo + K - 1 = W + 2*padding)

    # ---- JAX glue: W-direction prepack only (no full im2col in HBM) ----
    xb = x_nchw.astype(jnp.bfloat16)
    xp = jnp.pad(xb, ((0, 0), (0, 0),
                      (padding, Hp - H - padding),      # extra bottom rows pad Ho->Ho_pad
                      (padding, padding)))
    # feature order f = cin*K + kw  (matches the weight flattening below)
    cols = jnp.stack([xp[:, :, :, kw:kw + Wo] for kw in range(K)], axis=2)
    feat = cols.reshape(N, KC, Hp, Wo)
    feat = jnp.pad(feat, ((0, 0), (0, KC_pad - KC), (0, 0), (0, 0)))
    # Pre-haloed row tiles; (rows, Wo) flattened into one lane-major axis so the
    # kernel can take each per-kh window as a plain static lane slice.
    tiles = jnp.stack([feat[:, :, rt * R: rt * R + halo, :] for rt in range(nrt)],
                      axis=1)                             # (N, nrt, KC_pad, halo, Wo)
    p = tiles.reshape(N, nrt, KC_pad, halo * Wo)

    # weights: (Cout,Cin,Kh,Kw) -> (Kh, Cout, Cin*Kw), zero-pad contraction 27->32
    w9 = jnp.transpose(weight, (2, 0, 1, 3)).reshape(K, Cout, KC)
    w9 = jnp.pad(w9, ((0, 0), (0, 0), (0, KC_pad - KC))).astype(jnp.bfloat16)
    b_col = bias.astype(jnp.float32).reshape(Cout, 1)
    alpha_s = jnp.asarray(alpha, jnp.float32).reshape(1, 1)

    def kernel(alpha_ref, p_ref, w_ref, b_ref, o_ref):
        # acc(Cout, T) = sum_kh  W_kh(Cout, 32) @ P_kh(32, T)   (MXU, f32 accum)
        acc = jnp.dot(w_ref[0], p_ref[0, 0, :, pl.ds(0, T)],
                      preferred_element_type=jnp.float32)
        for kh in range(1, K):
            acc = acc + jnp.dot(w_ref[kh], p_ref[0, 0, :, pl.ds(kh * Wo, T)],
                                preferred_element_type=jnp.float32)
        acc = acc + b_ref[...]                    # (Cout, 1) broadcasts over lanes
        a = alpha_ref[0, 0]
        o_ref[0] = jnp.where(acc >= 0.0, acc, a * acc).astype(o_ref.dtype)

    blk_in = KC_pad * halo * Wo * 2               # bf16 prepack tile
    blk_out = Cout * T * jnp.dtype(out_dtype).itemsize
    vmem_limit = int(min(110 * 1024 * 1024,
                         max(32 * 1024 * 1024, 3 * (blk_in + blk_out))))

    cost = pl.CostEstimate(
        flops=2 * N * Ho * Wo * K * KC * Cout,
        transcendentals=0,
        bytes_accessed=(p.size * 2 + w9.size * 2 + b_col.size * 4 + 4
                        + N * Cout * Ho_pad * Wo * jnp.dtype(out_dtype).itemsize))

    out = pl.pallas_call(
        kernel,
        out_shape=jax.ShapeDtypeStruct((N, Cout, Ho_pad * Wo), out_dtype),
        grid=(N, nrt),
        in_specs=[
            pl.BlockSpec(memory_space=pltpu.MemorySpace.SMEM),                 # alpha
            pl.BlockSpec((1, 1, KC_pad, halo * Wo), lambda b, rt: (b, rt, 0, 0)),
            pl.BlockSpec((K, Cout, KC_pad), lambda b, rt: (0, 0, 0)),          # resident
            pl.BlockSpec((Cout, 1), lambda b, rt: (0, 0)),                     # resident
        ],
        out_specs=pl.BlockSpec((1, Cout, T), lambda b, rt: (b, 0, rt)),
        compiler_params=pltpu.CompilerParams(
            dimension_semantics=("parallel", "parallel"),
            vmem_limit_bytes=vmem_limit,
        ),
        cost_estimate=cost,
    )(alpha_s, p, w9, b_col)

    # (N, Cout, Ho_pad*Wo) -> NCHW; the reshape is free, only row un-pad copies.
    out = out.reshape(N, Cout, Ho_pad, Wo)
    if Ho_pad != Ho:
        out = out[:, :, :Ho, :]
    return out


if __name__ == "__main__":
    key = jax.random.PRNGKey(0)
    k_x, k_w, k_b = jax.random.split(key, 3)

    N, Cin, H, W = 2, 3, 16, 16
    Cout, K, PAD = 64, 9, 4

    x = jax.random.normal(k_x, (N, Cin, H, W), dtype=jnp.float32)

    # Deterministic parameter init (PyTorch-like uniform(-1/sqrt(fan_in), ...))
    fan_in = Cin * K * K
    bound = 1.0 / (fan_in ** 0.5)
    weight = jax.random.uniform(k_w, (Cout, Cin, K, K), jnp.float32, -bound, bound)
    bias = jax.random.uniform(k_b, (Cout,), jnp.float32, -bound, bound)
    alpha = jnp.float32(0.25)   # nn.PReLU() default single-parameter init

    fwd = jax.jit(lambda xx, ww, bb, aa: conv_block_forward(
        xx, ww, bb, aa, kernel_size=K, padding=PAD, stride=1))
    y = jax.block_until_ready(fwd(x, weight, bias, alpha))

    # Reference check against plain-JAX (f32) conv + PReLU
    ref = jax.lax.conv_general_dilated(
        x, weight, window_strides=(1, 1), padding=[(PAD, PAD), (PAD, PAD)],
        dimension_numbers=("NCHW", "OIHW", "NCHW"))
    ref = ref + bias.reshape(1, Cout, 1, 1)
    ref = jnp.where(ref >= 0, ref, alpha * ref)

    assert y.shape == (N, Cout, H, W), y.shape
    # bf16 activations/weights with f32 accumulation: loosened tolerance vs f32 ref.
    max_err = float(jnp.max(jnp.abs(y - ref)))
    assert jnp.allclose(y, ref, atol=5e-2, rtol=5e-2), max_err

    print("KERNEL_OK")
</pallas_src>

<mosaic_0001>
module attributes {stable_mosaic.version = 11 : i64} {
  func.func @kernel(%arg0: i32, %arg1: i32, %arg2: memref<1x1xf32, #tpu.memory_space<smem>>, %arg3: memref<1x1x32x256xbf16, #tpu.memory_space<vmem>>, %arg4: memref<9x64x32xbf16, #tpu.memory_space<vmem>>, %arg5: memref<64x1xf32, #tpu.memory_space<vmem>>, %arg6: memref<1x64x128xf32, #tpu.memory_space<vmem>>) attributes {dimension_semantics = [#tpu.dimension_semantics<parallel>, #tpu.dimension_semantics<parallel>], iteration_bounds = array<i64: 2, 2>, scalar_prefetch = 0 : i64, scratch_operands = 0 : i64, tpu.core_type = #tpu.core_type<tc>, window_params = [{transform_indices = @transform_0, window_bounds = array<i64: 1, 1>}, {transform_indices = @transform_1, window_bounds = array<i64: 1, 1, 32, 256>}, {pipeline_mode = #tpu.pipeline_mode<synchronous>, transform_indices = @transform_2, window_bounds = array<i64: 9, 64, 32>}, {pipeline_mode = #tpu.pipeline_mode<synchronous>, transform_indices = @transform_3, window_bounds = array<i64: 64, 1>}, {transform_indices = @transform_4, window_bounds = array<i64: 1, 64, 128>}]} {
    %c0 = arith.constant 0 : index
    %c0_0 = arith.constant 0 : index
    %c0_1 = arith.constant 0 : index
    %0 = vector.load %arg4[%c0, %c0_0, %c0_1] : memref<9x64x32xbf16, #tpu.memory_space<vmem>>, vector<1x64x32xbf16>
    %1 = vector.shape_cast %0 : vector<1x64x32xbf16> to vector<64x32xbf16>
    %c0_2 = arith.constant 0 : index
    %c0_3 = arith.constant 0 : index
    %c0_4 = arith.constant 0 : index
    %c0_5 = arith.constant 0 : index
    %2 = vector.load %arg3[%c0_2, %c0_3, %c0_4, %c0_5] : memref<1x1x32x256xbf16, #tpu.memory_space<vmem>>, vector<1x1x32x128xbf16>
    %3 = vector.shape_cast %2 : vector<1x1x32x128xbf16> to vector<32x128xbf16>
    %cst = arith.constant dense<0.000000e+00> : vector<64x128xf32>
    %4 = tpu.matmul %1, %3, %cst {dimension_numbers = #tpu.dot_dimension_numbers<[1], [0], [0], [1], [0, 0, 1, 1], [], []>} : vector<64x32xbf16>, vector<32x128xbf16>, vector<64x128xf32> -> vector<64x128xf32>
    %c1 = arith.constant 1 : index
    %c0_6 = arith.constant 0 : index
    %c0_7 = arith.constant 0 : index
    %5 = vector.load %arg4[%c1, %c0_6, %c0_7] : memref<9x64x32xbf16, #tpu.memory_space<vmem>>, vector<1x64x32xbf16>
    %6 = vector.shape_cast %5 : vector<1x64x32xbf16> to vector<64x32xbf16>
    %c0_8 = arith.constant 0 : index
    %c0_9 = arith.constant 0 : index
    %c0_10 = arith.constant 0 : index
    %c16 = arith.constant 16 : index
    %7 = vector.load %arg3[%c0_8, %c0_9, %c0_10, %c16] : memref<1x1x32x256xbf16, #tpu.memory_space<vmem>>, vector<1x1x32x128xbf16>
    %8 = vector.shape_cast %7 : vector<1x1x32x128xbf16> to vector<32x128xbf16>
    %cst_11 = arith.constant dense<0.000000e+00> : vector<64x128xf32>
    %9 = tpu.matmul %6, %8, %cst_11 {dimension_numbers = #tpu.dot_dimension_numbers<[1], [0], [0], [1], [0, 0, 1, 1], [], []>} : vector<64x32xbf16>, vector<32x128xbf16>, vector<64x128xf32> -> vector<64x128xf32>
    %10 = arith.addf %4, %9 : vector<64x128xf32>
    %c2 = arith.constant 2 : index
    %c0_12 = arith.constant 0 : index
    %c0_13 = arith.constant 0 : index
    %11 = vector.load %arg4[%c2, %c0_12, %c0_13] : memref<9x64x32xbf16, #tpu.memory_space<vmem>>, vector<1x64x32xbf16>
    %12 = vector.shape_cast %11 : vector<1x64x32xbf16> to vector<64x32xbf16>
    %c0_14 = arith.constant 0 : index
    %c0_15 = arith.constant 0 : index
    %c0_16 = arith.constant 0 : index
    %c32 = arith.constant 32 : index
    %13 = vector.load %arg3[%c0_14, %c0_15, %c0_16, %c32] : memref<1x1x32x256xbf16, #tpu.memory_space<vmem>>, vector<1x1x32x128xbf16>
    %14 = vector.shape_cast %13 : vector<1x1x32x128xbf16> to vector<32x128xbf16>
    %cst_17 = arith.constant dense<0.000000e+00> : vector<64x128xf32>
    %15 = tpu.matmul %12, %14, %cst_17 {dimension_numbers = #tpu.dot_dimension_numbers<[1], [0], [0], [1], [0, 0, 1, 1], [], []>} : vector<64x32xbf16>, vector<32x128xbf16>, vector<64x128xf32> -> vector<64x128xf32>
    %16 = arith.addf %10, %15 : vector<64x128xf32>
    %c3 = arith.constant 3 : index
    %c0_18 = arith.constant 0 : index
    %c0_19 = arith.constant 0 : index
    %17 = vector.load %arg4[%c3, %c0_18, %c0_19] : memref<9x64x32xbf16, #tpu.memory_space<vmem>>, vector<1x64x32xbf16>
    %18 = vector.shape_cast %17 : vector<1x64x32xbf16> to vector<64x32xbf16>
    %c0_20 = arith.constant 0 : index
    %c0_21 = arith.constant 0 : index
    %c0_22 = arith.constant 0 : index
    %c48 = arith.constant 48 : index
    %19 = vector.load %arg3[%c0_20, %c0_21, %c0_22, %c48] : memref<1x1x32x256xbf16, #tpu.memory_space<vmem>>, vector<1x1x32x128xbf16>
    %20 = vector.shape_cast %19 : vector<1x1x32x128xbf16> to vector<32x128xbf16>
    %cst_23 = arith.constant dense<0.000000e+00> : vector<64x128xf32>
    %21 = tpu.matmul %18, %20, %cst_23 {dimension_numbers = #tpu.dot_dimension_numbers<[1], [0], [0], [1], [0, 0, 1, 1], [], []>} : vector<64x32xbf16>, vector<32x128xbf16>, vector<64x128xf32> -> vector<64x128xf32>
    %22 = arith.addf %16, %21 : vector<64x128xf32>
    %c4 = arith.constant 4 : index
    %c0_24 = arith.constant 0 : index
    %c0_25 = arith.constant 0 : index
    %23 = vector.load %arg4[%c4, %c0_24, %c0_25] : memref<9x64x32xbf16, #tpu.memory_space<vmem>>, vector<1x64x32xbf16>
    %24 = vector.shape_cast %23 : vector<1x64x32xbf16> to vector<64x32xbf16>
    %c0_26 = arith.constant 0 : index
    %c0_27 = arith.constant 0 : index
    %c0_28 = arith.constant 0 : index
    %c64 = arith.constant 64 : index
    %25 = vector.load %arg3[%c0_26, %c0_27, %c0_28, %c64] : memref<1x1x32x256xbf16, #tpu.memory_space<vmem>>, vector<1x1x32x128xbf16>
    %26 = vector.shape_cast %25 : vector<1x1x32x128xbf16> to vector<32x128xbf16>
    %cst_29 = arith.constant dense<0.000000e+00> : vector<64x128xf32>
    %27 = tpu.matmul %24, %26, %cst_29 {dimension_numbers = #tpu.dot_dimension_numbers<[1], [0], [0], [1], [0, 0, 1, 1], [], []>} : vector<64x32xbf16>, vector<32x128xbf16>, vector<64x128xf32> -> vector<64x128xf32>
    %28 = arith.addf %22, %27 : vector<64x128xf32>
    %c5 = arith.constant 5 : index
    %c0_30 = arith.constant 0 : index
    %c0_31 = arith.constant 0 : index
    %29 = vector.load %arg4[%c5, %c0_30, %c0_31] : memref<9x64x32xbf16, #tpu.memory_space<vmem>>, vector<1x64x32xbf16>
    %30 = vector.shape_cast %29 : vector<1x64x32xbf16> to vector<64x32xbf16>
    %c0_32 = arith.constant 0 : index
    %c0_33 = arith.constant 0 : index
    %c0_34 = arith.constant 0 : index
    %c80 = arith.constant 80 : index
    %31 = vector.load %arg3[%c0_32, %c0_33, %c0_34, %c80] : memref<1x1x32x256xbf16, #tpu.memory_space<vmem>>, vector<1x1x32x128xbf16>
    %32 = vector.shape_cast %31 : vector<1x1x32x128xbf16> to vector<32x128xbf16>
    %cst_35 = arith.constant dense<0.000000e+00> : vector<64x128xf32>
    %33 = tpu.matmul %30, %32, %cst_35 {dimension_numbers = #tpu.dot_dimension_numbers<[1], [0], [0], [1], [0, 0, 1, 1], [], []>} : vector<64x32xbf16>, vector<32x128xbf16>, vector<64x128xf32> -> vector<64x128xf32>
    %34 = arith.addf %28, %33 : vector<64x128xf32>
    %c6 = arith.constant 6 : index
    %c0_36 = arith.constant 0 : index
    %c0_37 = arith.constant 0 : index
    %35 = vector.load %arg4[%c6, %c0_36, %c0_37] : memref<9x64x32xbf16, #tpu.memory_space<vmem>>, vector<1x64x32xbf16>
    %36 = vector.shape_cast %35 : vector<1x64x32xbf16> to vector<64x32xbf16>
    %c0_38 = arith.constant 0 : index
    %c0_39 = arith.constant 0 : index
    %c0_40 = arith.constant 0 : index
    %c96 = arith.constant 96 : index
    %37 = vector.load %arg3[%c0_38, %c0_39, %c0_40, %c96] : memref<1x1x32x256xbf16, #tpu.memory_space<vmem>>, vector<1x1x32x128xbf16>
    %38 = vector.shape_cast %37 : vector<1x1x32x128xbf16> to vector<32x128xbf16>
    %cst_41 = arith.constant dense<0.000000e+00> : vector<64x128xf32>
    %39 = tpu.matmul %36, %38, %cst_41 {dimension_numbers = #tpu.dot_dimension_numbers<[1], [0], [0], [1], [0, 0, 1, 1], [], []>} : vector<64x32xbf16>, vector<32x128xbf16>, vector<64x128xf32> -> vector<64x128xf32>
    %40 = arith.addf %34, %39 : vector<64x128xf32>
    %c7 = arith.constant 7 : index
    %c0_42 = arith.constant 0 : index
    %c0_43 = arith.constant 0 : index
    %41 = vector.load %arg4[%c7, %c0_42, %c0_43] : memref<9x64x32xbf16, #tpu.memory_space<vmem>>, vector<1x64x32xbf16>
    %42 = vector.shape_cast %41 : vector<1x64x32xbf16> to vector<64x32xbf16>
    %c0_44 = arith.constant 0 : index
    %c0_45 = arith.constant 0 : index
    %c0_46 = arith.constant 0 : index
    %c112 = arith.constant 112 : index
    %43 = vector.load %arg3[%c0_44, %c0_45, %c0_46, %c112] : memref<1x1x32x256xbf16, #tpu.memory_space<vmem>>, vector<1x1x32x128xbf16>
    %44 = vector.shape_cast %43 : vector<1x1x32x128xbf16> to vector<32x128xbf16>
    %cst_47 = arith.constant dense<0.000000e+00> : vector<64x128xf32>
    %45 = tpu.matmul %42, %44, %cst_47 {dimension_numbers = #tpu.dot_dimension_numbers<[1], [0], [0], [1], [0, 0, 1, 1], [], []>} : vector<64x32xbf16>, vector<32x128xbf16>, vector<64x128xf32> -> vector<64x128xf32>
    %46 = arith.addf %40, %45 : vector<64x128xf32>
    %c8 = arith.constant 8 : index
    %c0_48 = arith.constant 0 : index
    %c0_49 = arith.constant 0 : index
    %47 = vector.load %arg4[%c8, %c0_48, %c0_49] : memref<9x64x32xbf16, #tpu.memory_space<vmem>>, vector<1x64x32xbf16>
    %48 = vector.shape_cast %47 : vector<1x64x32xbf16> to vector<64x32xbf16>
    %c0_50 = arith.constant 0 : index
    %c0_51 = arith.constant 0 : index
    %c0_52 = arith.constant 0 : index
    %c128 = arith.constant 128 : index
    %49 = vector.load %arg3[%c0_50, %c0_51, %c0_52, %c128] : memref<1x1x32x256xbf16, #tpu.memory_space<vmem>>, vector<1x1x32x128xbf16>
    %50 = vector.shape_cast %49 : vector<1x1x32x128xbf16> to vector<32x128xbf16>
    %cst_53 = arith.constant dense<0.000000e+00> : vector<64x128xf32>
    %51 = tpu.matmul %48, %50, %cst_53 {dimension_numbers = #tpu.dot_dimension_numbers<[1], [0], [0], [1], [0, 0, 1, 1], [], []>} : vector<64x32xbf16>, vector<32x128xbf16>, vector<64x128xf32> -> vector<64x128xf32>
    %52 = arith.addf %46, %51 : vector<64x128xf32>
    %c0_54 = arith.constant 0 : index
    %c0_55 = arith.constant 0 : index
    %53 = vector.load %arg5[%c0_54, %c0_55] : memref<64x1xf32, #tpu.memory_space<vmem>>, vector<64x1xf32>
    %54 = vector.broadcast %53 : vector<64x1xf32> to vector<64x128xf32>
    %55 = arith.addf %52, %54 : vector<64x128xf32>
    %c0_56 = arith.constant 0 : index
    %c0_57 = arith.constant 0 : index
    %56 = memref.load %arg2[%c0_56, %c0_57] : memref<1x1xf32, #tpu.memory_space<smem>>
    %cst_58 = arith.constant 0.000000e+00 : f32
    %57 = vector.broadcast %cst_58 : f32 to vector<64x128xf32>
    %58 = arith.cmpf oge, %55, %57 : vector<64x128xf32>
    %59 = vector.broadcast %56 : f32 to vector<64x128xf32>
    %60 = arith.mulf %59, %55 : vector<64x128xf32>
    %61 = arith.select %58, %55, %60 : vector<64x128xi1>, vector<64x128xf32>
    %c0_59 = arith.constant 0 : index
    %c0_60 = arith.constant 0 : index
    %c0_61 = arith.constant 0 : index
    %62 = vector.load %arg6[%c0_59, %c0_60, %c0_61] : memref<1x64x128xf32, #tpu.memory_space<vmem>>, vector<1x64x128xf32>
    %63 = vector.shape_cast %62 : vector<1x64x128xf32> to vector<64x128xf32>
    %64 = vector.shape_cast %61 : vector<64x128xf32> to vector<1x64x128xf32>
    tpu.vector_store %arg6[%c0_59, %c0_60, %c0_61], %64 {strides = array<i32>} : memref<1x64x128xf32, #tpu.memory_space<vmem>>, vector<1x64x128xf32>,
    return
  }
  func.func @transform_0(%arg0: i32, %arg1: i32) -> (i32, i32) {
    %c0_i32 = arith.constant 0 : i32
    %c0_i32_0 = arith.constant 0 : i32
    %c0_i32_1 = arith.constant 0 : i32
    return %c0_i32, %c0_i32_0 : i32, i32
  }
  func.func @transform_1(%arg0: i32, %arg1: i32) -> (i32, i32, i32, i32) {
    %c0_i32 = arith.constant 0 : i32
    %c0_i32_0 = arith.constant 0 : i32
    %c0_i32_1 = arith.constant 0 : i32
    return %arg0, %arg1, %c0_i32, %c0_i32_0 : i32, i32, i32, i32
  }
  func.func @transform_2(%arg0: i32, %arg1: i32) -> (i32, i32, i32) {
    %c0_i32 = arith.constant 0 : i32
    %c0_i32_0 = arith.constant 0 : i32
    %c0_i32_1 = arith.constant 0 : i32
    %c0_i32_2 = arith.constant 0 : i32
    return %c0_i32, %c0_i32_0, %c0_i32_1 : i32, i32, i32
  }
  func.func @transform_3(%arg0: i32, %arg1: i32) -> (i32, i32) {
    %c0_i32 = arith.constant 0 : i32
    %c0_i32_0 = arith.constant 0 : i32
    %c0_i32_1 = arith.constant 0 : i32
    return %c0_i32, %c0_i32_0 : i32, i32
  }
  func.func @transform_4(%arg0: i32, %arg1: i32) -> (i32, i32, i32) {
    %c0_i32 = arith.constant 0 : i32
    %c0_i32_0 = arith.constant 0 : i32
    return %arg0, %c0_i32, %arg1 : i32, i32, i32
  }
}

</mosaic_0001>

<bundles_post_ra>
// kernel: _lambda_.1
= control target key start
LH: loop header
LB: loop body
LE: loop exit
PB: predicated region body
PF: predicated region fallthrough
CT: control target
= control target key end

     0   :  { %s2516_s0 = inlined_call_operand.<no memory space> [shape: f32[1,1], index: 0, kind: input, shape index: {}]   ;;  %s2517_s1 = inlined_call_operand.vmem [shape: bf16[2,2,32,256], index: 1, kind: input, shape index: {}]   ;;  %s2518_s2 = inlined_call_operand.vmem [shape: bf16[9,64,32], index: 2, kind: input, shape index: {}]   ;;  %s2519_s3 = inlined_call_operand.vmem [shape: f32[64,1], index: 3, kind: input, shape index: {}]   ;;  %s2520_s4 = inlined_call_operand.vmem [shape: f32[2,64,256], index: 4, kind: output, shape index: {}]  }
   0x1   :  { %9 = sst [smem:[#allocation2]] %s2516_s0 }
   0x2   :  { %s2201_s17 = smov 0   ;;  %s2203_s18 = smov 0  }
   0x3   :  { %s2205_s19 = smov 0   ;;  %s2207_s20 = smov 0  }
   0x4   :  { %s2209_s21 = smov 0   ;;  %s2211_s22 = smov 0  }
   0x5   :  { %s2213_s23 = smov 0  }
   0x6 LB: > { %s24_s0 = sadd.s32 1, %s2155_s21  ;;  %s27_s24 = sadd.s32 1, %s2159_s22  ;;  %s2163_s23 = sphi %s2213_s23, %s15_s23   ;;  %s2159_s22 = sphi %s2211_s22, %s2527_s22   ;;  %s2155_s21 = sphi %s2209_s21, %s2526_s21   ;;  %s2151_s20 = sphi %s2207_s20, %s2525_s20   ;;  %s2147_s19 = sphi %s2205_s19, %s2524_s19   ;;  %s2143_s18 = sphi %s2203_s18, %s2523_s18   ;;  %s2139_s17 = sphi %s2201_s17, %s2522_s17  }
   0x7   : > { %p25_p0 = scmp.ge.s32.totalorder %s24_s0, 2  ;;  %s1609_s25 = sadd.s32 4294967295, %s2163_s23  }
   0x8   : > { %p137_p1 = scmp.ne.s32.totalorder %s2143_s18, %s2139_s17  ;;  %p138_p2 = scmp.eq.s32.totalorder %s1609_s25, 3 }
   0x9   : > { %s2529_s0 = smov (%p25_p0, %s24_s0), 0  ;;  %s2531_s24 = smov (!%p25_p0, %s27_s24), %s2159_s22 }
   0xa   : > { %s123_s26 = ssub.s32 %s2155_s21, %s2529_s0  ;;  %p29_p3 = scmp.ge.s32.totalorder %s2531_s24, 2 }
   0xb   : > { %p1613_p4 = scmp.ge.s32.totalorder %s2163_s23, 1  ;;  %p2247_p5 = por %p138_p2, %p137_p1 }
   0xc   : > { %p183_p6 = scmp.lt.s32.totalorder %s2163_s23, 5  ;;  %s2533_s24 = smov (%p29_p3, %s2531_s24), 0 }
   0xd   : > { %s122_s28 = ssub.s32 %s2159_s22, %s2533_s24  ;;  %s127_s30 = sadd.s32 1, %s2143_s18 }
   0xe   : > { %p184_p7 = pnand %p1613_p4, %p183_p6  ;;  %s124_s29 = sor.u32 %s123_s26, %s122_s28 }
   0xf   : > { %p125_p8 = scmp.eq.s32.totalorder %s124_s29, 0  ;;  %p212_p9 = scmp.lt.s32.totalorder (!%p184_p7), %s2151_s20, 1  ;;  %v2069_v0 = vld [vmem:[%s2518_s2 + $0x20] sm:$0xff] (!%p184_p7)   ;;  %vm296_vm0 = vcmask (!%p184_p7), 261120   ;;  %v1376_v6 = vld [vmem:[%s2519_s3 + $0x8] sm:$0xff] (!%p184_p7)  ;;  %v2172_v8 = vmov (!%p184_p7), 0  }
  0x10   : > { %187 = sbr.rel (%p184_p7) target bundleno = 463 (0x1cf), region = 36  ;;  %p214_p10 = scmp.lt.s32.totalorder (!%p184_p7), %s2147_s19, 1  ;;  %1825 = vmatprep.mubr.msk.bf16.mxu1 (!%p184_p7), %vm296_vm0, %v2069_v0  ;;  %v2071_v3 = vld [vmem:[%s2518_s2 + $0x80] sm:$0xff] (!%p184_p7)   ;;  %2062 = vset.pattern.permute.xlu1 (!%p184_p7), %v2172_v8  ;;  %v1377_v9 = vld [vmem:[%s2519_s3 + $0x10] sm:$0xff] (!%p184_p7)  ;;  %v1378_v10 = vld [vmem:[%s2519_s3 + $0x18] sm:$0xff] (!%p184_p7)  ;;  %vm774_vm1 = vcmask (!%p184_p7), 523264  }
  0x11   : > { %s2258_s5 = scalar_select %p125_p8, %s2143_s18, %s127_s30  }
  0x12   : > { %s2165_s25 = smov (!%p184_p7), 64   ;;  %s2166_s26 = smov (!%p184_p7), 112   ;;  %1873 = vmatprep.mubr.msk.bf16.mxu0 (!%p184_p7), %vm296_vm0, %v2071_v3  ;;  %v1375_v7 = vld [vmem:[%s2519_s3] sm:$0xff] (!%p184_p7)  ;;  %2061 = vset.pattern.permute.xlu0 (!%p184_p7), %v2172_v8  ;;  %v1380_v12 = vld [vmem:[%s2519_s3 + $0x28] sm:$0xff] (!%p184_p7)  ;;  %v1381_v13 = vld [vmem:[%s2519_s3 + $0x30] sm:$0xff] (!%p184_p7)  ;;  %vm291_vm2 = vcmask (!%p184_p7), 916480  }
  0x13   : > { %s2167_s30 = smov (!%p184_p7), 48   ;;  %v1379_v11 = vld [vmem:[%s2519_s3 + $0x20] sm:$0xff] (!%p184_p7)  ;;  %v1382_v14 = vld [vmem:[%s2519_s3 + $0x38] sm:$0xff] (!%p184_p7)  ;;  %v2070_v25 = vld [vmem:[%s2518_s2 + $0x28] sm:$0xff] (!%p184_p7)   ;;  %vm901_vm3 = vcmask (!%p184_p7), 392192   ;;  %vm520_vm4 = vcmask (!%p184_p7), 785408  }
  0x14   : > { %v2074_v28 = vld [vmem:[%s2518_s2 + $0x30] sm:$0xff] (!%p184_p7)   ;;  %v2073_v31 = vld [vmem:[%s2518_s2 + $0x88] sm:$0xff] (!%p184_p7)   ;;  %v2078_v34 = vld [vmem:[%s2518_s2 + $0xa0] sm:$0xff] (!%p184_p7)   ;;  %vm1155_vm5 = vcmask (!%p184_p7), 130048   ;;  %vm647_vm6 = vcmask (!%p184_p7), 654336   ;;  %s1431_s28 = sld [smem:[#allocation2]] (!%p184_p7) }
  0x15   : > { %v2075_v36 = vld [vmem:[%s2518_s2 + $0x38] sm:$0xff] (!%p184_p7)   ;;  %v2077_v37 = vld [vmem:[%s2518_s2] sm:$0xff] (!%p184_p7)   ;;  %v2079_v44 = vld [vmem:[%s2518_s2 + $0x8] sm:$0xff] (!%p184_p7)   ;;  %s209_s29 = sand.u32 (!%p184_p7), 1, %s2139_s17  }
  0x16   : > { %v2080_v45 = vld [vmem:[%s2518_s2 + $0xa8] sm:$0xff] (!%p184_p7)   ;;  %v2081_v48 = vld [vmem:[%s2518_s2 + $0x10] sm:$0xff] (!%p184_p7)   ;;  %v2083_v54 = vld [vmem:[%s2518_s2 + $0x18] sm:$0xff] (!%p184_p7)  }
  0x17   : > { %s213_s6 = scalar_select %p212_p9, %s2151_s20, 1  ;;  %v2082_v50 = vld [vmem:[%s2518_s2 + $0xb0] sm:$0xff]   ;;  %v2084_v55 = vld [vmem:[%s2518_s2 + $0xb8] sm:$0xff]   ;;  %v2085_v56 = vld [vmem:[%s2518_s2 + $0x40] sm:$0xff]  }
  0x18   : > { %s215_s7 = scalar_select %p214_p10, %s2147_s19, 1  ;;  %v2086_v59 = vld [vmem:[%s2518_s2 + $0xc0] sm:$0xff]   ;;  %v2087_v0 = vld [vmem:[%s2518_s2 + $0x48] sm:$0xff]  }
  0x19   : > { %s1616_s8 = sshll.u32 %s213_s6, 4  ;;  %s2168_s6 = smov 32  }
  0x1a   : > { %s1615_s9 = sshll.u32 %s215_s7, 3  ;;  %s2169_s7 = smov 96  }
  0x1b   : > { %s218_s10 = sadd.s32 %s1616_s8, %s1615_s9  ;;  %s2170_s8 = smov 16  }
  0x1c   : > { %s1617_s11 = sshll.u32 %s218_s10, 2  ;;  %s2171_s9 = smov 80  }
  0x1d   : > { %s2267_s14 = scalar_lea.vmem %s2517_s1, %s1617_s11 }
  0x1e   : > { %v2063_v1 = vld [vmem:[%s2267_s14] ss:$8 sps:$4 sm:$0xff]   ;;  %v2065_v2 = vld [vmem:[%s2267_s14 + $0x4] ss:$8 sps:$4 sm:$0xff]   ;;  %v2066_v4 = vld [vmem:[%s2267_s14 + $0x14] ss:$8 sps:$4 sm:$0xff]  }
  0x1f   : > { %766 = vrot.lane.b32.xlu1 %v2063_v1, %s2165_s25  ;;  %283 = vrot.lane.b32.xlu0 %v2063_v1, %s2166_s26  ;;  %v2068_v5 = vld [vmem:[%s2267_s14 + $0x10] ss:$8 sps:$4 sm:$0xff]   ;;  %v2072_v23 = vld [vmem:[%s2267_s14] ss:$8 sps:$4 sm:$0xff]  }
  0x20   : > { %v2076_v29 = vld [vmem:[%s2267_s14 + $0x10] ss:$8 sps:$4 sm:$0xff]  }
  0x23   : > { %768 = vrot.lane.b32.xlu1 %v2065_v2, %s2165_s25  ;;  %285 = vrot.lane.b32.xlu0 %v2065_v2, %s2166_s26 }
  0x27   : > { %289 = vrot.lane.b32.xlu1 %v2066_v4, %s2166_s26  ;;  %287 = vrot.lane.b32.xlu0 %v2068_v5, %s2166_s26 }
  0x2b   : > { %772 = vrot.lane.b32.xlu1 %v2066_v4, %s2165_s25  ;;  %770 = vrot.lane.b32.xlu0 %v2068_v5, %s2165_s25 }
  0x2f   : > { %895 = vrot.lane.b32.xlu1 %v2065_v2, %s2167_s30  ;;  %893 = vrot.lane.b32.xlu0 %v2063_v1, %s2167_s30 }
  0x33   : > { %899 = vrot.lane.b32.xlu1 %v2066_v4, %s2167_s30  ;;  %897 = vrot.lane.b32.xlu0 %v2068_v5, %s2167_s30  ;;  %s1614_s30 = sshll.u32 %s209_s29, 6 }
  0x34   : > { %s2470_s17 = scalar_lea.vmem [#allocation3], %s1614_s30 }
  0x37   : > { %1022 = vrot.lane.b32.xlu1 %v2065_v2, %s2168_s6  ;;  %1020 = vrot.lane.b32.xlu0 %v2063_v1, %s2168_s6 }
  0x3b   : > { %514 = vrot.lane.b32.xlu1 %v2065_v2, %s2169_s7  ;;  %512 = vrot.lane.b32.xlu0 %v2063_v1, %s2169_s7 }
  0x3f   : > { %1026 = vrot.lane.b32.xlu1 %v2066_v4, %s2168_s6  ;;  %1024 = vrot.lane.b32.xlu0 %v2068_v5, %s2168_s6 }
  0x43   : > { %518 = vrot.lane.b32.xlu1 %v2066_v4, %s2169_s7  ;;  %516 = vrot.lane.b32.xlu0 %v2068_v5, %s2169_s7 }
  0x47   : > { %1149 = vrot.lane.b32.xlu1 %v2065_v2, %s2170_s8  ;;  %1147 = vrot.lane.b32.xlu0 %v2063_v1, %s2170_s8 }
  0x4b   : > { %641 = vrot.lane.b32.xlu1 %v2065_v2, %s2171_s9  ;;  %639 = vrot.lane.b32.xlu0 %v2063_v1, %s2171_s9  ;;  %v2088_v1 = vld [vmem:[%s2518_s2 + $0xc8] sm:$0xff]  }
  0x4f   : > { %1153 = vrot.lane.b32.xlu1 %v2066_v4, %s2170_s8  ;;  %1151 = vrot.lane.b32.xlu0 %v2068_v5, %s2170_s8 }
  0x53   : > { %645 = vrot.lane.b32.xlu1 %v2066_v4, %s2171_s9  ;;  %643 = vrot.lane.b32.xlu0 %v2068_v5, %s2171_s9  ;;  %v2089_v4 = vld [vmem:[%s2518_s2 + $0x50] sm:$0xff]  }
  0x57   : > { %1390 = vperm.xlu1 %2062, %v1376_v6   ;;  %1385 = vperm.xlu0 %2061, %v1375_v7   ;;  %v2090_v6 = vld [vmem:[%s2518_s2 + $0xd0] sm:$0xff]  }
  0x5b   : > { %1395 = vperm.xlu1 %2062, %v1377_v9   ;;  %1400 = vperm.xlu0 %2061, %v1378_v10   ;;  %v2097_v9 = vld [vmem:[%s2267_s14 + $0x4] ss:$8 sps:$4 sm:$0xff]  }
  0x5f   : > { %1405 = vperm.xlu1 %2062, %v1379_v11   ;;  %1410 = vperm.xlu0 %2061, %v1380_v12   ;;  %v2091_v11 = vld [vmem:[%s2518_s2 + $0x58] sm:$0xff]  }
  0x60   : > { %v2092_v12 = vld [vmem:[%s2518_s2 + $0xd8] sm:$0xff]  }
  0x63   : > { %1415 = vperm.xlu1 %2062, %v1381_v13   ;;  %1420 = vperm.xlu0 %2061, %v1382_v14  }
  0x91   : > { %v767_v15 = vpop.permute.xlu1 %766  ;;  %v284_v16 = vpop.permute.xlu0 %283 }
  0x95   : > { %v769_v17 = vpop.permute.xlu1 %768  ;;  %v286_v18 = vpop.permute.xlu0 %285 }
  0x96   : > { %v2306_v19 = vsel %vm774_vm1, %v767_v15, %v769_v17  ;;  %v292_v20 = vsel %vm291_vm2, %v284_v16, %v286_v18  ;;  %v2093_v15 = vld [vmem:[%s2518_s2 + $0x60] sm:$0xff]   ;;  %v2095_v18 = vld [vmem:[%s2518_s2 + $0x68] sm:$0xff]  }
  0x97   : > { %1821 = vmatprep.subr.bf16.mxu1 %v292_v20  ;;  %1869 = vmatprep.subr.bf16.mxu0 %v2306_v19  ;;  %v2094_v17 = vld [vmem:[%s2518_s2 + $0xe0] sm:$0xff]  }
  0x98   : > { %1822 = vmatpush3.bf16.msra.mxu1 %v292_v20  ;;  %1870 = vmatpush3.bf16.msra.mxu0 %v2306_v19  ;;  %v2096_v20 = vld [vmem:[%s2518_s2 + $0xe8] sm:$0xff]  }
  0x99   : > { %v290_v21 = vpop.permute.xlu1 %289  ;;  %v288_v22 = vpop.permute.xlu0 %287 }
  0x9a   : > { %v293_v24 = vsel %vm291_vm2, %v288_v22, %v290_v21  ;;  %v2098_v21 = vld [vmem:[%s2518_s2 + $0x70] sm:$0xff]  }
  0x9b   : > { %1823 = vmatprep.subr.bf16.mxu1 %v293_v24  ;;  %v2099_v22 = vld [vmem:[%s2518_s2 + $0xf0] sm:$0xff]  }
  0x9c   : > { %1824 = vmatpush3.bf16.msra.mxu1 %v293_v24  ;;  %v2100_v24 = vld [vmem:[%s2518_s2 + $0x78] sm:$0xff]  }
  0x9d   : > { %v773_v26 = vpop.permute.xlu1 %772  ;;  %v771_v27 = vpop.permute.xlu0 %770  ;;  %1833 = vmatprep.subr.bf16.mxu1 %v2072_v23 }
  0x9e   : > { %v2319_v30 = vsel %vm774_vm1, %v771_v27, %v773_v26  ;;  %v2103_v26 = vld [vmem:[%s2518_s2 + $0x100] sm:$0xff]   ;;  %v2104_v27 = vld [vmem:[%s2518_s2 + $0x108] sm:$0xff]  }
  0x9f   : > { %1826 = vmatmul.mubr.msk.bf16.vlgmr.msra.gmra.mrb[0].mxu1 %vm296_vm0, %v2070_v25  ;;  %1871 = vmatprep.subr.bf16.mxu0 %v2319_v30  ;;  %v2105_v25 = vld [vmem:[%s2518_s2 + $0x90] sm:$0xff]  }
  0xa0   : > { %1872 = vmatpush3.bf16.msra.mxu0 %v2319_v30  ;;  %1834 = vmatpush3.bf16.msra.mxu1 %v2072_v23  ;;  %v2102_v23 = vld [vmem:[%s2267_s14 + $0x14] ss:$8 sps:$4 sm:$0xff]   ;;  %s1763_s14 = sshll.u32 (%p2247_p5), %s2151_s20, 4 }
  0xa1   : > { %v896_v32 = vpop.permute.xlu1 %895  ;;  %v894_v33 = vpop.permute.xlu0 %893  ;;  %1829 = vmatprep.mubr.msk.bf16.mxu1 %vm296_vm0, %v2074_v28  ;;  %1835 = vmatprep.subr.bf16.mxu1 %v2076_v29  ;;  %v2107_v28 = vld [vmem:[%s2518_s2 + $0x110] sm:$0xff]   ;;  %s1473_s6 = sadd.s32 (%p2247_p5), %s2147_s19, %s1763_s14 }
  0xa2   : > { %v902_v35 = vsel %vm901_vm3, %v894_v33, %v896_v32  ;;  %s1764_s27 = sshll.u32 (%p2247_p5), %s1473_s6, 3 }
  0xa3   : > { %1874 = vmatmul.mubr.msk.bf16.vlgmr.msra.gmra.mrb[0].mxu0 %vm296_vm0, %v2073_v31  ;;  %1881 = vmatprep.subr.bf16.mxu0 %v902_v35  ;;  %s1475_s9 = scalar_lea.vmem (%p2247_p5), %s2520_s4, %s1764_s27 }
  0xa4   : > { %1882 = vmatpush3.bf16.msra.mxu0 %v902_v35  ;;  %1836 = vmatpush3.bf16.msra.mxu1 %v2076_v29  ;;  %v2106_v29 = vld [vmem:[%s2518_s2 + $0x98] sm:$0xff]  }
  0xa5   : > { %v900_v38 = vpop.permute.xlu1 %899  ;;  %v898_v39 = vpop.permute.xlu0 %897  ;;  %1885 = vmatprep.mubr.msk.bf16.mxu0 %vm296_vm0, %v2078_v34 }
  0xa6   : > { %v903_v40 = vsel %vm901_vm3, %v898_v39, %v900_v38 }
  0xa7   : > { %1830 = vmatmul.mubr.msk.bf16.gmra.mrb[4].mxu1 %vm296_vm0, %v2075_v36  ;;  %1883 = vmatprep.subr.bf16.mxu0 %v903_v40 }
  0xa8   : > { %1884 = vmatpush3.bf16.msra.mxu0 %v903_v40  ;;  %1837 = vmatprep.mubr.msk.bf16.mxu1 %vm296_vm0, %v2077_v37 }
  0xa9   : > { %v1023_v41 = vpop.permute.xlu1 %1022  ;;  %v1021_v42 = vpop.permute.xlu0 %1020 }
  0xaa   : > { %v1029_v43 = vsel %vm296_vm0, %v1021_v42, %v1023_v41  ;;  %v1440_v42 = vstv %s1431_s28 }
  0xab   : > { %1893 = vmatprep.subr.bf16.mxu0 %v1029_v43 }
  0xad   : > { %v515_v46 = vpop.permute.xlu1 %514  ;;  %v513_v47 = vpop.permute.xlu0 %512 }
  0xae   : > { %v521_v49 = vsel %vm520_vm4, %v513_v47, %v515_v46 }
  0xaf   : > { %1838 = vmatmul.mubr.msk.bf16.vlgmr.msra.gmra.mrb[0].mxu1 %vm296_vm0, %v2079_v44  ;;  %1886 = vmatmul.mubr.msk.bf16.vlgmr.msra.gmra.mrb[0].mxu0 %vm296_vm0, %v2080_v45 }
  0xb0   : > { %1894 = vmatpush3.bf16.msra.mxu0 %v1029_v43  ;;  %1845 = vmatprep.subr.bf16.mxu1 %v521_v49 }
  0xb1   : > { %v1027_v51 = vpop.permute.xlu1 %1026  ;;  %v1025_v52 = vpop.permute.xlu0 %1024  ;;  %1846 = vmatpush3.bf16.msra.mxu1 %v521_v49  ;;  %1841 = vmatprep.mubr.msk.bf16.mxu1 %vm296_vm0, %v2081_v48 }
  0xb2   : > { %1889 = vmatprep.mubr.msk.bf16.mxu0 %vm296_vm0, %v2082_v50  ;;  %v1030_v53 = vsel %vm296_vm0, %v1025_v52, %v1027_v51 }
  0xb3   : > { %1895 = vmatprep.subr.bf16.mxu0 %v1030_v53 }
  0xb4   : > { %1896 = vmatpush3.bf16.msra.mxu0 %v1030_v53 }
  0xb5   : > { %v519_v57 = vpop.permute.xlu1 %518  ;;  %v517_v58 = vpop.permute.xlu0 %516 }
  0xb6   : > { %v522_v60 = vsel %vm520_vm4, %v517_v58, %v519_v57 }
  0xb7   : > { %1842 = vmatmul.mubr.msk.bf16.gmra.mrb[4].mxu1 %vm296_vm0, %v2083_v54  ;;  %1890 = vmatmul.mubr.msk.bf16.gmra.mrb[4].mxu0 %vm296_vm0, %v2084_v55 }
  0xb8   : > { %1847 = vmatprep.subr.bf16.mxu1 %v522_v60  ;;  %1849 = vmatprep.mubr.msk.bf16.mxu1 %vm296_vm0, %v2085_v56 }
  0xb9   : > { %v1150_v61 = vpop.permute.xlu1 %1149  ;;  %v1148_v62 = vpop.permute.xlu0 %1147  ;;  %1848 = vmatpush3.bf16.msra.mxu1 %v522_v60  ;;  %1897 = vmatprep.mubr.msk.bf16.mxu0 %vm296_vm0, %v2086_v59 }
  0xba   : > { %v1156_v63 = vsel %vm1155_vm5, %v1148_v62, %v1150_v61 }
  0xbb   : > { %1905 = vmatprep.subr.bf16.mxu0 %v1156_v63 }
  0xbd   : > { %v642_v2 = vpop.permute.xlu1 %641  ;;  %v640_v3 = vpop.permute.xlu0 %639 }
  0xbe   : > { %v648_v5 = vsel %vm647_vm6, %v640_v3, %v642_v2 }
  0xbf   : > { %1850 = vmatmul.mubr.msk.bf16.vlgmr.msra.gmra.mrb[0].mxu1 %vm296_vm0, %v2087_v0  ;;  %1898 = vmatmul.mubr.msk.bf16.vlgmr.msra.gmra.mrb[0].mxu0 %vm296_vm0, %v2088_v1 }
  0xc0   : > { %1906 = vmatpush3.bf16.msra.mxu0 %v1156_v63  ;;  %1857 = vmatprep.subr.bf16.mxu1 %v648_v5 }
  0xc1   : > { %v1154_v7 = vpop.permute.xlu1 %1153  ;;  %v1152_v8 = vpop.permute.xlu0 %1151  ;;  %1858 = vmatpush3.bf16.msra.mxu1 %v648_v5  ;;  %1853 = vmatprep.mubr.msk.bf16.mxu1 %vm296_vm0, %v2089_v4 }
  0xc2   : > { %1901 = vmatprep.mubr.msk.bf16.mxu0 %vm296_vm0, %v2090_v6  ;;  %v1157_v10 = vsel %vm1155_vm5, %v1152_v8, %v1154_v7 }
  0xc3   : > { %1907 = vmatprep.subr.bf16.mxu0 %v1157_v10 }
  0xc4   : > { %1908 = vmatpush3.bf16.msra.mxu0 %v1157_v10 }
  0xc5   : > { %v646_v13 = vpop.permute.xlu1 %645  ;;  %v644_v14 = vpop.permute.xlu0 %643  ;;  %1917 = vmatprep.subr.bf16.mxu0 %v2097_v9 }
  0xc6   : > { %v649_v16 = vsel %vm647_vm6, %v644_v14, %v646_v13 }
  0xc7   : > { %1854 = vmatmul.mubr.msk.bf16.gmra.mrb[4].mxu1 %vm296_vm0, %v2091_v11  ;;  %1859 = vmatprep.subr.bf16.mxu1 %v649_v16 }
  0xc8   : > { %1902 = vmatmul.mubr.msk.bf16.gmra.mrb[4].mxu0 %vm296_vm0, %v2092_v12  ;;  %1860 = vmatpush3.bf16.msra.mxu1 %v649_v16 }
  0xc9   : > { %1929 = vmatprep.subr.bf16.mxu1 %v2306_v19  ;;  %1861 = vmatprep.mubr.msk.bf16.mxu1 %vm296_vm0, %v2093_v15 }
  0xca   : > { %1909 = vmatprep.mubr.msk.bf16.mxu0 %vm296_vm0, %v2094_v17 }
  0xcf   : > { %1862 = vmatmul.mubr.msk.bf16.vlgmr.msra.gmra.mrb[0].mxu1 %vm296_vm0, %v2095_v18 }
  0xd0   : > { %1931 = vmatpush3.bf16.msra.mxu1 %v2306_v19  ;;  %1910 = vmatmul.mubr.msk.bf16.vlgmr.msra.gmra.mrb[0].mxu0 %vm296_vm0, %v2096_v20  ;;  %v2101_v19 = vld [vmem:[%s2518_s2 + $0xf8] sm:$0xff]  }
  0xd1   : > { %1930 = vmatprep.subr.bf16.mxu1 %v2319_v30  ;;  %1918 = vmatpush3.bf16.msra.mxu0 %v2097_v9 }
  0xd2   : > { %1865 = vmatprep.mubr.msk.bf16.mxu1 %vm296_vm0, %v2098_v21  ;;  %1913 = vmatprep.mubr.msk.bf16.mxu0 %vm296_vm0, %v2099_v22 }
  0xd3   : > { %1919 = vmatprep.subr.bf16.mxu0 %v2102_v23 }
  0xd4   : > { %1932 = vmatpush3.bf16.msra.mxu1 %v2319_v30  ;;  %v2108_v30 = vld [vmem:[%s2518_s2 + $0x118] sm:$0xff]  }
  0xd5   : > { %1920 = vmatpush3.bf16.msra.mxu0 %v2102_v23 }
  0xd6   : > { %v1391_v35 = vpop.permute.xlu1 %1390  ;;  %v1386_v36 = vpop.permute.xlu0 %1385 }
  0xd7   : > { %1866 = vmatmul.mubr.msk.bf16.gmra.mrb[4].mxu1 %vm296_vm0, %v2100_v24 }
  0xd8   : > { %1914 = vmatmul.mubr.msk.bf16.gmra.mrb[4].mxu0 %vm296_vm0, %v2101_v19  ;;  %1877 = vmatprep.mubr.msk.bf16.mxu1 %vm296_vm0, %v2105_v25 }
  0xd9   : > { %1921 = vmatprep.mubr.msk.bf16.mxu0 %vm296_vm0, %v2103_v26 }
  0xda   : > { %v1396_v37 = vpop.permute.xlu1 %1395  ;;  %v1401_v38 = vpop.permute.xlu0 %1400 }
  0xde   : > { %v1406_v49 = vpop.permute.xlu1 %1405  ;;  %v1411_v56 = vpop.permute.xlu0 %1410 }
  0xe0   : > { %1922 = vmatmul.mubr.msk.bf16.vlgmr.msra.gmra.mrb[0].mxu0 %vm296_vm0, %v2104_v27 }
  0xe1   : > { %1925 = vmatprep.mubr.msk.bf16.mxu0 %vm296_vm0, %v2107_v28 }
  0xe2   : > { %v1416_v4 = vpop.permute.xlu1 %1415  ;;  %v1421_v11 = vpop.permute.xlu0 %1420 }
  0xe3   : > { %1878 = vmatmul.mubr.msk.bf16.vlgmr.msra.gmra.mrb[4].mxu1 %vm296_vm0, %v2106_v29 }
  0xe8   : > { %1926 = vmatmul.mubr.msk.bf16.gmra.mrb[4].mxu0 %vm296_vm0, %v2108_v30 }
 0x1a2   : > { %v1863_v31 = vpop.f32.mrb[0].mxu1 }
 0x1a3   : > { %v698_v32 = vpop.f32.mrb[1].mxu1 }
 0x1a4   : > { %v1864_v33 = vpop.f32.mrb[2].mxu1 }
 0x1a5   : > { %v701_v34 = vpop.f32.mrb[3].mxu1 }
 0x1b3   : > { %v1923_v39 = vpop.f32.mrb[0].mxu0 }
 0x1b4   : > { %v1933_v40 = vadd.f32 %v1923_v39, %v1863_v31  ;;  %v1336_v41 = vpop.f32.mrb[1].mxu0 }
 0x1b5   : > { %v1934_v43 = vadd.f32 %v1336_v41, %v698_v32  ;;  %v1924_v44 = vpop.f32.mrb[2].mxu0 }
 0x1b6   : > { %v1425_v45 = vadd.f32 %v1933_v40, %v1396_v37  ;;  %v1935_v46 = vadd.f32 %v1924_v44, %v1864_v33  ;;  %v1339_v47 = vpop.f32.mrb[3].mxu0  ;;  %v1879_v48 = vpop.f32.mrb[4].mxu1 }
 0x1b7   : > { %v1423_v50 = vadd.f32 %v1934_v43, %v1386_v36  ;;  %v1936_v51 = vadd.f32 %v1339_v47, %v701_v34  ;;  %v841_v52 = vpop.f32.mrb[5].mxu1 }
 0x1b8   : > { %vm1434_vm7 = vcmp.ge.f32.partialorder %v1425_v45, 0.0  ;;  %v1443_v53 = vmul.f32 %v1440_v42, %v1425_v45  ;;  %v1426_v54 = vadd.f32 %v1935_v46, %v1401_v38  ;;  %v1880_v55 = vpop.f32.mrb[6].mxu1 }
 0x1b9   : > { %vm1432_vm8 = vcmp.ge.f32.partialorder %v1423_v50, 0.0  ;;  %v1441_v57 = vmul.f32 %v1440_v42, %v1423_v50  ;;  %v1424_v58 = vadd.f32 %v1936_v51, %v1391_v35  ;;  %v844_v59 = vpop.f32.mrb[7].mxu1 }
 0x1ba   : > { %v1451_v60 = vsel %vm1434_vm7, %v1425_v45, %v1443_v53  ;;  %vm1435_vm9 = vcmp.ge.f32.partialorder %v1426_v54, 0.0  ;;  %v1444_v61 = vmul.f32 %v1440_v42, %v1426_v54 }
 0x1bb   : > { %1459 = vst [vmem:[%s2470_s17 + $0x10] sm:$0xff] %v1451_v60  ;;  %v1449_v62 = vsel %vm1432_vm8, %v1423_v50, %v1441_v57  ;;  %vm1433_vm10 = vcmp.ge.f32.partialorder %v1424_v58, 0.0  ;;  %v1442_v63 = vmul.f32 %v1440_v42, %v1424_v58  ;;  %v1927_v0 = vpop.f32.mrb[4].mxu0 }
 0x1bc   : > { %1457 = vst [vmem:[%s2470_s17] sm:$0xff] %v1449_v62  ;;  %v1452_v1 = vsel %vm1435_vm9, %v1426_v54, %v1444_v61  ;;  %v1937_v2 = vadd.f32 %v1927_v0, %v1879_v48  ;;  %v1352_v3 = vpop.f32.mrb[5].mxu0 }
 0x1bd   : > { %1460 = vst [vmem:[%s2470_s17 + $0x18] sm:$0xff] %v1452_v1  ;;  %v1450_v5 = vsel %vm1433_vm10, %v1424_v58, %v1442_v63  ;;  %v1938_v6 = vadd.f32 %v1352_v3, %v841_v52  ;;  %v1928_v7 = vpop.f32.mrb[6].mxu0 }
 0x1be   : > { %1458 = vst [vmem:[%s2470_s17 + $0x8] sm:$0xff] %v1450_v5  ;;  %v1429_v8 = vadd.f32 %v1937_v2, %v1416_v4  ;;  %v1939_v9 = vadd.f32 %v1928_v7, %v1880_v55  ;;  %v1355_v10 = vpop.f32.mrb[7].mxu0 }
 0x1bf   : > { %v1427_v12 = vadd.f32 %v1938_v6, %v1406_v49  ;;  %v1940_v13 = vadd.f32 %v1355_v10, %v844_v59 }
 0x1c0   : > { %vm1438_vm11 = vcmp.ge.f32.partialorder %v1429_v8, 0.0  ;;  %v1447_v14 = vmul.f32 %v1440_v42, %v1429_v8  ;;  %v1430_v15 = vadd.f32 %v1939_v9, %v1421_v11  ;;  %1471 = sbr.rel (!%p2247_p5) target bundleno = 463 (0x1cf), region = 40 }
 0x1c1   : > { %vm1436_vm12 = vcmp.ge.f32.partialorder %v1427_v12, 0.0  ;;  %v1445_v16 = vmul.f32 %v1440_v42, %v1427_v12  ;;  %v1428_v17 = vadd.f32 %v1940_v13, %v1411_v56 }
 0x1c2   : > { %v1455_v18 = vsel %vm1438_vm11, %v1429_v8, %v1447_v14  ;;  %vm1439_vm13 = vcmp.ge.f32.partialorder %v1430_v15, 0.0  ;;  %v1448_v20 = vmul.f32 %v1440_v42, %v1430_v15  ;;  %v1521_v26 = vld [vmem:[%s2470_s17 + $0x10] sm:$0xff] (%p2247_p5) }
 0x1c3   : > { %1463 = vst [vmem:[%s2470_s17 + $0x30] sm:$0xff] %v1455_v18  ;;  %v1453_v21 = vsel %vm1436_vm12, %v1427_v12, %v1445_v16  ;;  %vm1437_vm14 = vcmp.ge.f32.partialorder %v1428_v17, 0.0  ;;  %v1446_v22 = vmul.f32 %v1440_v42, %v1428_v17  ;;  %v1517_v19 = vld [vmem:[%s2470_s17] sm:$0xff] (%p2247_p5)  ;;  %1522 = vst [vmem:[%s1475_s9 + $0x20] sm:$0xff] (%p2247_p5), %v1521_v26 }
 0x1c4   : > { %1461 = vst [vmem:[%s2470_s17 + $0x20] sm:$0xff] %v1453_v21  ;;  %v1456_v23 = vsel %vm1439_vm13, %v1430_v15, %v1448_v20  ;;  %v1523_v27 = vld [vmem:[%s2470_s17 + $0x18] sm:$0xff] (%p2247_p5)  ;;  %1518 = vst [vmem:[%s1475_s9] sm:$0xff] (%p2247_p5), %v1517_v19 }
 0x1c5   : > { %1464 = vst [vmem:[%s2470_s17 + $0x38] sm:$0xff] %v1456_v23  ;;  %v1454_v24 = vsel %vm1437_vm14, %v1428_v17, %v1446_v22  ;;  %v1519_v25 = vld [vmem:[%s2470_s17 + $0x8] sm:$0xff] (%p2247_p5)  ;;  %1524 = vst [vmem:[%s1475_s9 + $0x30] sm:$0xff] (%p2247_p5), %v1523_v27 }
 0x1c6   : > { %1462 = vst [vmem:[%s2470_s17 + $0x28] sm:$0xff] %v1454_v24  ;;  %1520 = vst [vmem:[%s1475_s9 + $0x10] sm:$0xff] (%p2247_p5), %v1519_v25 }
 0x1ca   : > { %v1529_v30 = vld [vmem:[%s2470_s17 + $0x30] sm:$0xff] }
 0x1cb   : > { %v1525_v28 = vld [vmem:[%s2470_s17 + $0x20] sm:$0xff]  ;;  %1530 = vst [vmem:[%s1475_s9 + $0x60] sm:$0xff] %v1529_v30 }
 0x1cc   : > { %v1531_v31 = vld [vmem:[%s2470_s17 + $0x38] sm:$0xff]  ;;  %1526 = vst [vmem:[%s1475_s9 + $0x40] sm:$0xff] %v1525_v28 }
 0x1cd   : > { %v1527_v29 = vld [vmem:[%s2470_s17 + $0x28] sm:$0xff]  ;;  %1532 = vst [vmem:[%s1475_s9 + $0x70] sm:$0xff] %v1531_v31 }
 0x1ce   : > { %1528 = vst [vmem:[%s1475_s9 + $0x50] sm:$0xff] %v1527_v29 }
 0x1cf PF: > { %s15_s23 = sadd.s32 1, %s2163_s23   ;;  %s2522_s17 = smov %s2143_s18 }
 0x1d0   : > { %p12_p11 = scmp.ge.s32.totalorder %s15_s23, 6   ;;  %s2523_s18 = smov %s2258_s5 }
 0x1d1   : > { %s2524_s19 = smov %s2155_s21  ;;  %s2525_s20 = smov %s2159_s22 }
 0x1d2   : > { %s2526_s21 = smov %s2529_s0  ;;  %s2527_s22 = smov %s2533_s24 }
 0x1d3   :  { %14 = sbr.rel (!%p12_p11) target bundleno = 6 (0x6), region = 112 }

</bundles_post_ra>
